<compile_context>
chip_gen: v5e
topology: v5e:2x2
jax: 0.10.0
libtpu: 0.0.40
codegen_flags: <defaults>
</compile_context>

<pallas_src>
import functools
import math

import jax
import jax.numpy as jnp
from jax import lax
from jax.experimental import pallas as pl
from jax.experimental.pallas import tpu as pltpu


# ---------------------------------------------------------------------------
# Hardware probes (generation-aware tuning)
# ---------------------------------------------------------------------------
def _tpu_generation():
    """Best-effort TPU generation (4/5/6/7) from the device kind string."""
    try:
        kind = jax.devices()[0].device_kind.lower()
    except Exception:
        return 0
    for gen in (7, 6, 5, 4):
        if f"v{gen}" in kind:
            return gen
    return 0


def _vmem_limit_bytes():
    """Explicit scoped-VMEM limit: half of physical VMEM, capped at 64 MiB."""
    try:
        cap = int(pltpu.get_tpu_info().vmem_capacity_bytes)
    except Exception:
        cap = 64 * 1024 * 1024          # conservative (v7x physical per-TC)
    return int(min(cap // 2, 64 * 1024 * 1024))


# ---------------------------------------------------------------------------
# Pallas kernel: packed per-cluster softmax attention
# ---------------------------------------------------------------------------
def _packed_cluster_attn_kernel(bias_ref, q_ref, k_ref, v_ref, o_ref, *,
                                norm_factor, apply_bias, exp_dtype):
    """In-cluster softmax attention on packed (PC, D) tiles.

    q_ref/k_ref: (S, PC, D) bf16; v_ref: (S, PC, Dv) bf16; o_ref: (S, PC, Dv).
    bias_ref: (PC, PC) f32 additive block-diagonal mask (resident, DMA'd once).

    The body loops over the leading S axis so only one (PC, PC) f32 tile of
    scores/probs is live at a time: temporaries are bounded (~hundreds of KiB)
    and the per-step VMEM budget is just the pipelined I/O blocks.
    """
    s_tiles = q_ref.shape[0]
    bias = bias_ref[...] if apply_bias else None

    def body(g, carry):
        q = q_ref[g]                                         # (PC, D)  bf16
        if norm_factor != 1.0:
            # scale the small bf16 q tile, not the (PC, PC) f32 scores
            q = q * norm_factor
        k = k_ref[g]                                         # (PC, D)  bf16
        v = v_ref[g]                                         # (PC, Dv) bf16

        s = jnp.einsum("qd,kd->qk", q, k,
                       preferred_element_type=jnp.float32)   # (PC, PC) f32
        if apply_bias:
            s = s + bias                                     # block-diag mask

        m = jnp.max(s, axis=-1, keepdims=True)               # f32 row max
        # bf16 exp on v6e/v7x (EUP is the binding unit there); f32 on v5e.
        p = jnp.exp((s - m).astype(exp_dtype))
        denom = jnp.sum(p, axis=-1, keepdims=True, dtype=jnp.float32)

        o = jnp.einsum("qk,kd->qd", p.astype(v.dtype), v,
                       preferred_element_type=jnp.float32)   # (PC, Dv) f32
        o = o * pl.reciprocal(denom, approx=True)            # EUP recip
        o_ref[g] = o.astype(o_ref.dtype)
        return carry

    lax.fori_loop(0, s_tiles, body, 0)


def cluster_attention(q_sorted, k_sorted, v_sorted, norm_factor,
                      out_dtype=jnp.bfloat16):
    """Softmax attention restricted to each cluster.

    q_sorted/k_sorted: (G, C, D); v_sorted: (G, C, Dv).  Cluster g attends only
    within itself.  Returns (G, C, Dv) in out_dtype (bf16 by default to halve
    the output + unsort HBM traffic on mem-bound chips).
    """
    G, C, D = q_sorted.shape
    Dv = v_sorted.shape[-1]
    gen = _tpu_generation()

    # Pack P clusters per MXU tile so contractions are ~(128, D) x (D, 128).
    # Keep PC ~ 128 on every generation: softmax/EUP work and score volume
    # scale with PC and bind before the MXU, so 256-wide packing doesn't pay.
    P = max(1, 128 // C)
    PC = P * C
    n_super = pl.cdiv(G, P)

    # ---- super-tiles per grid step (S) ------------------------------------
    # Budget the double-buffered I/O blocks against an explicit scoped-VMEM
    # limit; the in-kernel (PC, PC) temporaries are bounded by the fori_loop
    # and covered by the reserve.
    lane = 128
    pad_d = pl.cdiv(D, lane) * lane
    pad_dv = pl.cdiv(Dv, lane) * lane
    in_item = 2                                     # bf16 q/k/v
    out_item = jnp.dtype(out_dtype).itemsize
    bytes_per_super = PC * (2 * pad_d * in_item + pad_dv * in_item
                            + pad_dv * out_item)
    vmem_limit = _vmem_limit_bytes()
    reserve = 4 * 1024 * 1024                       # f32 tiles, bias, scratch
    io_budget = max(vmem_limit - reserve, 1 * 1024 * 1024)
    s_cap = 32 if gen >= 7 else 96                  # v5e/v6e: larger grid steps
    S = max(1, min(io_budget // (2 * max(bytes_per_super, 1)),   # dbl-buffered
                   s_cap, n_super))

    n_super_pad = pl.cdiv(n_super, S) * S
    G_pad = n_super_pad * P

    def pad_and_pack(x):
        pad = G_pad - G
        if pad:
            x = jnp.concatenate(
                [x, jnp.zeros((pad,) + x.shape[1:], x.dtype)], axis=0)
        return x.reshape(n_super_pad, PC, x.shape[-1])

    qp = pad_and_pack(q_sorted.astype(jnp.bfloat16))
    kp = pad_and_pack(k_sorted.astype(jnp.bfloat16))
    vp = pad_and_pack(v_sorted.astype(jnp.bfloat16))

    # Precomputed additive block-diagonal mask (0 / -1e30): constant index_map
    # so it is DMA'd once and stays resident across every grid step.
    cluster_id = jnp.repeat(jnp.arange(P, dtype=jnp.int32), C)
    bias = jnp.where(cluster_id[:, None] == cluster_id[None, :],
                     0.0, -1e30).astype(jnp.float32)

    exp_dtype = jnp.bfloat16 if gen >= 6 else jnp.float32
    kernel = functools.partial(
        _packed_cluster_attn_kernel,
        norm_factor=float(norm_factor),
        apply_bias=(P > 1),
        exp_dtype=exp_dtype)

    # TODO(synk): if Dv << 128, the (..., Dv) output blocks are lane-sparse
    # (masked vst stores); a (S, Dv, PC)-transposed out layout is only a win if
    # the downstream unsort absorbs it without an extra HBM transpose pass.
    # TODO(synk): on v5e consider pipeline_mode=pl.Buffered(3) on the inputs if
    # xprof shows exposed input DMA (budget permitting).
    def call(dim_sem):
        return pl.pallas_call(
            kernel,
            out_shape=jax.ShapeDtypeStruct((n_super_pad, PC, Dv), out_dtype),
            grid_spec=pltpu.PrefetchScalarGridSpec(
                num_scalar_prefetch=0,
                grid=(n_super_pad // S,),
                in_specs=[
                    pl.BlockSpec((PC, PC), lambda i: (0, 0)),       # bias
                    pl.BlockSpec((S, PC, D), lambda i: (i, 0, 0)),  # q
                    pl.BlockSpec((S, PC, D), lambda i: (i, 0, 0)),  # k
                    pl.BlockSpec((S, PC, Dv), lambda i: (i, 0, 0)), # v
                ],
                out_specs=pl.BlockSpec((S, PC, Dv), lambda i: (i, 0, 0)),
            ),
            compiler_params=pltpu.CompilerParams(
                dimension_semantics=(dim_sem,),
                vmem_limit_bytes=vmem_limit),
        )(bias, qp, kp, vp)

    if gen >= 7:
        # v7x has 2 TensorCores/chip: only core-parallel semantics split the
        # grid across them.  Fall back to plain parallel if unsupported.
        try:
            out = call(pltpu.CORE_PARALLEL)
        except Exception:
            out = call(pltpu.PARALLEL)
    else:
        out = call(pltpu.PARALLEL)

    # Row-major reshapes only (no transpose); padded clusters dropped.
    return out.reshape(G_pad, C, Dv)[:G]


# ---------------------------------------------------------------------------
# SMYRF glue: asymmetric LSH, clustering, unsort
# ---------------------------------------------------------------------------
def smyrf_attention(queries, keys, values, cluster_size, norm_factor=1.0,
                    r=4.0, n_proj=8, lsh_key=None):
    B, Lq, D = queries.shape
    Lk = keys.shape[1]
    Dv = values.shape[-1]
    assert Lq % cluster_size == 0 and Lk % cluster_size == 0
    nq_clusters = Lq // cluster_size
    nk_clusters = Lk // cluster_size
    assert nq_clusters == nk_clusters, "equal q/k cluster counts (shared cluster_size)"

    if lsh_key is None:
        lsh_key = jax.random.PRNGKey(42)

    # SMYRF asymmetric transforms (f32 so bucketing is independent of the
    # kernel's bf16 compute dtype):
    #   F(k) = [k, sqrt(Mk^2 - |k|^2), 0],   G(q) = [q, 0, sqrt(Mq^2 - |q|^2)]
    q32 = queries.astype(jnp.float32)
    k32 = keys.astype(jnp.float32)
    q_norm = jnp.linalg.norm(q32, axis=-1, keepdims=True)
    k_norm = jnp.linalg.norm(k32, axis=-1, keepdims=True)
    Mq = jnp.max(q_norm, axis=1, keepdims=True)
    Mk = jnp.max(k_norm, axis=1, keepdims=True)
    q_ext = jnp.concatenate(
        [q32, jnp.zeros_like(q_norm),
         jnp.sqrt(jnp.maximum(Mq ** 2 - q_norm ** 2, 0.0))], axis=-1)
    k_ext = jnp.concatenate(
        [k32, jnp.sqrt(jnp.maximum(Mk ** 2 - k_norm ** 2, 0.0)),
         jnp.zeros_like(k_norm)], axis=-1)

    # E2LSH hashing: h(x) = sum_j floor((a_j . x + b_j) / r)
    ka, kb = jax.random.split(lsh_key)
    a = jax.random.normal(ka, (D + 2, n_proj), dtype=jnp.float32)
    b = jax.random.uniform(kb, (n_proj,), dtype=jnp.float32) * r
    q_hash = jnp.sum(jnp.floor((q_ext @ a + b) / r), axis=-1)      # (B, Lq)
    k_hash = jnp.sum(jnp.floor((k_ext @ a + b) / r), axis=-1)      # (B, Lk)

    # sort by hash -> balanced clusters of `cluster_size`
    q_perm = jnp.argsort(q_hash, axis=-1)
    k_perm = jnp.argsort(k_hash, axis=-1)

    # bf16 operands for the MXU (f32 accumulation in-kernel); halves the
    # gather/unsort HBM traffic as well.
    compute_dtype = jnp.bfloat16
    qs = jnp.take_along_axis(queries.astype(compute_dtype), q_perm[..., None], axis=1)
    ks = jnp.take_along_axis(keys.astype(compute_dtype), k_perm[..., None], axis=1)
    vs = jnp.take_along_axis(values.astype(compute_dtype), k_perm[..., None], axis=1)

    qs = qs.reshape(B * nq_clusters, cluster_size, D)
    ks = ks.reshape(B * nk_clusters, cluster_size, D)
    vs = vs.reshape(B * nk_clusters, cluster_size, Dv)

    # hot path: in-cluster softmax attention (Pallas), bf16 output
    out_sorted = cluster_attention(qs, ks, vs, norm_factor,
                                   out_dtype=jnp.bfloat16)
    out_sorted = out_sorted.reshape(B, Lq, Dv)

    # unsort query outputs (still bf16), cast to caller dtype last
    # TODO(synk): fuse the unsort (and input gathers) into the kernel's DMAs via
    # scalar-prefetched permutations to save the extra HBM passes.
    inv_perm = jnp.argsort(q_perm, axis=-1)
    out = jnp.take_along_axis(out_sorted, inv_perm[..., None], axis=1)
    return out.astype(queries.dtype)


class SmyrfWrapperPallas:
    """JAX/Pallas analog of SmyrfWrapper(smyrfdict)."""

    def __init__(self, smyrfdict):
        self.smyrfdict = dict(smyrfdict)

    def __call__(self, queries, keys, values, attn_mask=None, progress=False,
                 norm_factor=1, return_attn_map=False, att_sig='softmax',
                 return_attention_and_scores=False):
        assert queries.ndim == 3
        assert att_sig == 'softmax', "only softmax attention signature supported"
        # TODO(synk): attn_mask, return_attn_map/scores and multi-round
        # (n_hashes > 1) SMYRF recombination are not implemented.
        args = dict(self.smyrfdict)
        cluster_size = args.pop('cluster_size')
        return smyrf_attention(queries, keys, values, cluster_size,
                               norm_factor=norm_factor)


# ---------------------------------------------------------------------------
# MultiHeadAttention wrapper (prenorm + projections + attention + MLP)
# ---------------------------------------------------------------------------
def _layer_norm(x, gamma, beta, eps=1e-5):
    mu = jnp.mean(x, axis=-1, keepdims=True)
    var = jnp.var(x, axis=-1, keepdims=True)
    return (x - mu) * lax.rsqrt(var + eps) * gamma + beta


class MultiHeadAttentionPallas:
    """Forward-only JAX/Pallas analog of MultiHeadAttention.

    The attention hot path runs in the Pallas kernel above (SMYRF clustered
    attention, or dense softmax attention for the non-SMYRF path where one
    "cluster" spans the whole sequence).  Prenorms / linears / MLP are plain
    JAX.
    """

    def __init__(self, in_features, out_features=None, num_heads=1, bias=True,
                 mode='QK', score_function='softmax', norm_type='layer',
                 rezero=False, smyrf=None, key=None):
        assert norm_type == 'layer'          # TODO(synk): other NodeFeatNorm modes
        assert score_function == 'softmax'   # TODO(synk): sigmoid score_function
        while in_features % num_heads != 0:
            num_heads -= 1
        if out_features is None:
            out_features = in_features
        self.in_features = in_features
        self.out_features = out_features
        self.head_num = num_heads
        self.mode = mode
        self.smyrf = smyrf
        self.gate = jnp.zeros([]) if rezero else None

        key = jax.random.PRNGKey(0) if key is None else key
        ks = jax.random.split(key, 5)

        def linear(k, fan_in, fan_out):
            bound = 1.0 / math.sqrt(fan_in)
            w = jax.random.uniform(k, (fan_in, fan_out), jnp.float32, -bound, bound)
            b = jnp.zeros((fan_out,), jnp.float32) if bias else None
            return (w, b)

        # TODO(synk): spectral_norm (sn_wrap) not implemented.
        self.wq = linear(ks[0], in_features, in_features)
        self.wk = linear(ks[1], in_features, in_features) if mode == 'QK' else None
        self.wv = linear(ks[2], in_features, in_features)
        self.w1 = linear(ks[3], in_features, out_features)
        self.w2 = linear(ks[4], out_features, out_features)
        self.q_prenorm = (jnp.ones((in_features,)), jnp.zeros((in_features,)))
        self.out_prenorm = (jnp.ones((in_features,)), jnp.zeros((in_features,)))

    @staticmethod
    def _apply_linear(x, wb):
        w, b = wb
        y = x @ w
        return y + b if b is not None else y

    def _reshape_to_batches(self, x):
        b, l, f = x.shape
        d = f // self.head_num
        return x.reshape(b, l, self.head_num, d).transpose(0, 2, 1, 3).reshape(
            b * self.head_num, l, d)

    def _reshape_from_batches(self, x):
        bh, l, d = x.shape
        b = bh // self.head_num
        return x.reshape(b, self.head_num, l, d).transpose(0, 2, 1, 3).reshape(
            b, l, d * self.head_num)

    def __call__(self, q, k=None, v=None, mask=None):
        assert mask is None   # TODO(synk): attention masks not supported
        q_skip = q
        qn = _layer_norm(q, *self.q_prenorm)
        if k is None:
            k = qn
        if v is None:
            v = qn

        ql = self._apply_linear(qn, self.wq)
        vl = self._apply_linear(v, self.wv)
        kl = ql if self.mode == 'QQ' else self._apply_linear(k, self.wk)

        if self.smyrf is None or len(self.smyrf) == 0:
            qh = self._reshape_to_batches(ql)
            kh = self._reshape_to_batches(kl)
            vh = self._reshape_to_batches(vl)
            # TODO(synk): exact ScaledDotProductAttention scaling not in spec;
            # standard 1/sqrt(d_head) used.
            nf = 1.0 / math.sqrt(qh.shape[-1])
            y = cluster_attention(qh, kh, vh, nf,
                                  out_dtype=jnp.bfloat16).astype(q.dtype)
            y_att = self._reshape_from_batches(y)
        else:
            smyrf_args = dict(self.smyrf)
            cluster_size = smyrf_args.pop('cluster_size')
            y_att = smyrf_attention(ql, kl, vl, cluster_size, norm_factor=1.0)

        if self.gate is not None:
            y_att = self.gate * y_att
        y_att = y_att + q_skip
        y_att = _layer_norm(y_att, *self.out_prenorm)
        h = jax.nn.relu(self._apply_linear(y_att, self.w1))
        yo = self._apply_linear(h, self.w2)
        assert yo.shape[-1] == self.out_features
        return yo


if __name__ == "__main__":
    key = jax.random.PRNGKey(0)
    kq, kw1, kw2 = jax.random.split(key, 3)

    B, L, F = 2, 64, 32
    cluster_size = 16
    q = jax.random.normal(kq, (B, L, F), dtype=jnp.float32)

    # SMYRF path (clustered attention through the Pallas kernel)
    mha_smyrf = MultiHeadAttentionPallas(
        F, num_heads=1, score_function='softmax',
        smyrf={'cluster_size': cluster_size, 'n_hashes': 1}, key=kw1)
    out_smyrf = jax.block_until_ready(mha_smyrf(q))
    assert out_smyrf.shape == (B, L, F)
    assert jnp.all(jnp.isfinite(out_smyrf))

    # Dense (non-SMYRF) multi-head path -- same Pallas kernel, one cluster per
    # (batch, head) spanning the whole sequence.
    mha_dense = MultiHeadAttentionPallas(F, num_heads=2,
                                         score_function='softmax', key=kw2)
    out_dense = jax.block_until_ready(mha_dense(q))
    assert out_dense.shape == (B, L, F)
    assert jnp.all(jnp.isfinite(out_dense))

    # Direct SmyrfWrapper call (the wrapper class the original module builds).
    smyrf = SmyrfWrapperPallas({'cluster_size': cluster_size})
    out = jax.block_until_ready(smyrf(q, q, q, norm_factor=1.0 / math.sqrt(F)))
    assert out.shape == (B, L, F)
    assert jnp.all(jnp.isfinite(out))

    print("KERNEL_OK")
</pallas_src>

<mosaic_0001>
module attributes {stable_mosaic.version = 11 : i64} {
  func.func @_packed_cluster_attn_kernel(%arg0: i32, %arg1: memref<128x128xf32, #tpu.memory_space<vmem>>, %arg2: memref<1x128x32xbf16, #tpu.memory_space<vmem>>, %arg3: memref<1x128x32xbf16, #tpu.memory_space<vmem>>, %arg4: memref<1x128x32xbf16, #tpu.memory_space<vmem>>, %arg5: memref<1x128x32xbf16, #tpu.memory_space<vmem>>) attributes {dimension_semantics = [#tpu.dimension_semantics<parallel>], iteration_bounds = array<i64: 1>, scalar_prefetch = 0 : i64, scratch_operands = 0 : i64, tpu.core_type = #tpu.core_type<tc>, window_params = [{pipeline_mode = #tpu.pipeline_mode<synchronous>, transform_indices = @transform_0, window_bounds = array<i64: 128, 128>}, {transform_indices = @transform_1, window_bounds = array<i64: 1, 128, 32>}, {transform_indices = @transform_2, window_bounds = array<i64: 1, 128, 32>}, {transform_indices = @transform_3, window_bounds = array<i64: 1, 128, 32>}, {transform_indices = @transform_4, window_bounds = array<i64: 1, 128, 32>}]} {
    %c0 = arith.constant 0 : index
    %c0_0 = arith.constant 0 : index
    %0 = vector.load %arg1[%c0, %c0_0] : memref<128x128xf32, #tpu.memory_space<vmem>>, vector<128x128xf32>
    %c0_i32 = arith.constant 0 : i32
    %1 = arith.index_cast %c0_i32 : i32 to index
    %c0_1 = arith.constant 0 : index
    %c0_2 = arith.constant 0 : index
    %2 = vector.load %arg2[%1, %c0_1, %c0_2] : memref<1x128x32xbf16, #tpu.memory_space<vmem>>, vector<1x128x32xbf16>
    %3 = vector.shape_cast %2 : vector<1x128x32xbf16> to vector<128x32xbf16>
    %4 = arith.index_cast %c0_i32 : i32 to index
    %c0_3 = arith.constant 0 : index
    %c0_4 = arith.constant 0 : index
    %5 = vector.load %arg3[%4, %c0_3, %c0_4] : memref<1x128x32xbf16, #tpu.memory_space<vmem>>, vector<1x128x32xbf16>
    %6 = vector.shape_cast %5 : vector<1x128x32xbf16> to vector<128x32xbf16>
    %7 = arith.index_cast %c0_i32 : i32 to index
    %c0_5 = arith.constant 0 : index
    %c0_6 = arith.constant 0 : index
    %8 = vector.load %arg4[%7, %c0_5, %c0_6] : memref<1x128x32xbf16, #tpu.memory_space<vmem>>, vector<1x128x32xbf16>
    %9 = vector.shape_cast %8 : vector<1x128x32xbf16> to vector<128x32xbf16>
    "tpu.trace_start"() <{level = 10 : i32, message = "qd,kd->qk"}> : () -> ()
    %cst = arith.constant dense<0.000000e+00> : vector<128x128xf32>
    %10 = tpu.matmul %3, %6, %cst {dimension_numbers = #tpu.dot_dimension_numbers<[1], [1], [0], [0], [0, 0, 1, 0], [], []>} : vector<128x32xbf16>, vector<128x32xbf16>, vector<128x128xf32> -> vector<128x128xf32>
    "tpu.trace_stop"() : () -> ()
    %11 = arith.addf %10, %0 : vector<128x128xf32>
    %cst_7 = arith.constant dense<0xFF800000> : vector<128xf32>
    %12 = vector.multi_reduction <maximumf>, %11, %cst_7 [1] : vector<128x128xf32> to vector<128xf32>
    %13 = vector.shape_cast %12 : vector<128xf32> to vector<128x1xf32>
    %14 = vector.broadcast %13 : vector<128x1xf32> to vector<128x128xf32>
    %15 = arith.subf %11, %14 : vector<128x128xf32>
    %16 = math.exp %15 : vector<128x128xf32>
    %cst_8 = arith.constant dense<0.000000e+00> : vector<128xf32>
    %17 = vector.multi_reduction <add>, %16, %cst_8 [1] : vector<128x128xf32> to vector<128xf32>
    %18 = vector.shape_cast %17 : vector<128xf32> to vector<128x1xf32>
    %19 = arith.truncf %16 : vector<128x128xf32> to vector<128x128xbf16>
    "tpu.trace_start"() <{level = 10 : i32, message = "qk,kd->qd"}> : () -> ()
    %cst_9 = arith.constant dense<0.000000e+00> : vector<128x32xf32>
    %20 = tpu.matmul %19, %9, %cst_9 {dimension_numbers = #tpu.dot_dimension_numbers<[1], [0], [0], [1], [0, 0, 1, 1], [], []>} : vector<128x128xbf16>, vector<128x32xbf16>, vector<128x32xf32> -> vector<128x32xf32>
    "tpu.trace_stop"() : () -> ()
    %21 = tpu.reciprocal %18 {approx = true} : vector<128x1xf32> -> vector<128x1xf32>
    %22 = vector.broadcast %21 : vector<128x1xf32> to vector<128x32xf32>
    %23 = arith.mulf %20, %22 : vector<128x32xf32>
    %24 = arith.truncf %23 : vector<128x32xf32> to vector<128x32xbf16>
    %25 = arith.index_cast %c0_i32 : i32 to index
    %c0_10 = arith.constant 0 : index
    %c0_11 = arith.constant 0 : index
    %26 = vector.load %arg5[%25, %c0_10, %c0_11] : memref<1x128x32xbf16, #tpu.memory_space<vmem>>, vector<1x128x32xbf16>
    %27 = vector.shape_cast %26 : vector<1x128x32xbf16> to vector<128x32xbf16>
    %28 = vector.shape_cast %24 : vector<128x32xbf16> to vector<1x128x32xbf16>
    tpu.vector_store %arg5[%25, %c0_10, %c0_11], %28 {strides = array<i32>} : memref<1x128x32xbf16, #tpu.memory_space<vmem>>, vector<1x128x32xbf16>,
    %c1_i32 = arith.constant 1 : i32
    return
  }
  func.func @transform_0(%arg0: i32) -> (i32, i32) {
    %c0_i32 = arith.constant 0 : i32
    %c0_i32_0 = arith.constant 0 : i32
    %c0_i32_1 = arith.constant 0 : i32
    return %c0_i32, %c0_i32_0 : i32, i32
  }
  func.func @transform_1(%arg0: i32) -> (i32, i32, i32) {
    %c0_i32 = arith.constant 0 : i32
    %c0_i32_0 = arith.constant 0 : i32
    %c0_i32_1 = arith.constant 0 : i32
    return %arg0, %c0_i32, %c0_i32_0 : i32, i32, i32
  }
  func.func @transform_2(%arg0: i32) -> (i32, i32, i32) {
    %c0_i32 = arith.constant 0 : i32
    %c0_i32_0 = arith.constant 0 : i32
    %c0_i32_1 = arith.constant 0 : i32
    return %arg0, %c0_i32, %c0_i32_0 : i32, i32, i32
  }
  func.func @transform_3(%arg0: i32) -> (i32, i32, i32) {
    %c0_i32 = arith.constant 0 : i32
    %c0_i32_0 = arith.constant 0 : i32
    %c0_i32_1 = arith.constant 0 : i32
    return %arg0, %c0_i32, %c0_i32_0 : i32, i32, i32
  }
  func.func @transform_4(%arg0: i32) -> (i32, i32, i32) {
    %c0_i32 = arith.constant 0 : i32
    %c0_i32_0 = arith.constant 0 : i32
    %c0_i32_1 = arith.constant 0 : i32
    return %arg0, %c0_i32, %c0_i32_0 : i32, i32, i32
  }
}

</mosaic_0001>

<bundles_post_ra>
// kernel: tpu_custom_call.1
= control target key start
LH: loop header
LB: loop body
LE: loop exit
PB: predicated region body
PF: predicated region fallthrough
CT: control target
= control target key end

     0   :  { %vm161_vm0 = vcmask 261120   ;;  %vm524_vm1 = vcmask 257024   ;;  %s1042_s2 = inlined_call_operand.vmem [shape: bf16[1,128,32], index: 2, kind: input, shape index: {}]   ;;  %s1043_s1 = inlined_call_operand.vmem [shape: bf16[1,128,32], index: 1, kind: input, shape index: {}]   ;;  %s1044_s0 = inlined_call_operand.vmem [shape: f32[128,128], index: 0, kind: input, shape index: {}]   ;;  %s1045_s3 = inlined_call_operand.vmem [shape: bf16[1,128,32], index: 3, kind: input, shape index: {}]   ;;  %s1046_s4 = inlined_call_operand.vmem [shape: bf16[1,128,32], index: 4, kind: output, shape index: {}]  }
   0x1   :  { %v664_v0 = vld [vmem:[%s1042_s2 + $0x38] sm:$0xff]  ;;  %v663_v2 = vld [vmem:[%s1042_s2 + $0x30] sm:$0xff]  ;;  %v662_v4 = vld [vmem:[%s1042_s2 + $0x28] sm:$0xff] }
   0x2   :  { %v208_v1 = vsel %vm161_vm0, %v664_v0, 0  ;;  %v205_v3 = vsel %vm161_vm0, %v663_v2, 0  ;;  %v202_v5 = vsel %vm161_vm0, %v662_v4, 0  ;;  %v661_v6 = vld [vmem:[%s1042_s2 + $0x20] sm:$0xff]  ;;  %v660_v8 = vld [vmem:[%s1042_s2 + $0x18] sm:$0xff]  ;;  %v659_v10 = vld [vmem:[%s1042_s2 + $0x10] sm:$0xff] }
   0x3   :  { %210 = vmatpush.bf16.xpose.msra.mxu0 %v208_v1  ;;  %673 = vmatpush.bf16.xpose.msra.mxu2 %v208_v1  ;;  %v199_v7 = vsel %vm161_vm0, %v661_v6, 0  ;;  %v196_v9 = vsel %vm161_vm0, %v660_v8, 0  ;;  %v193_v11 = vsel %vm161_vm0, %v659_v10, 0  ;;  %v658_v12 = vld [vmem:[%s1042_s2 + $0x8] sm:$0xff]  ;;  %v657_v14 = vld [vmem:[%s1042_s2] sm:$0xff]  ;;  %v652_v17 = vld [vmem:[%s1043_s1 + $0x18] sm:$0xff] }
   0x4   :  { %v190_v13 = vsel %vm161_vm0, %v658_v12, 0  ;;  %v187_v15 = vsel %vm161_vm0, %v657_v14, 0  ;;  %v649_v16 = vld [vmem:[%s1043_s1] sm:$0xff]  ;;  %v650_v18 = vld [vmem:[%s1043_s1 + $0x8] sm:$0xff]  ;;  %v651_v20 = vld [vmem:[%s1043_s1 + $0x10] sm:$0xff] }
   0x5   :  { %v653_v19 = vld [vmem:[%s1043_s1 + $0x20] sm:$0xff]  ;;  %v654_v21 = vld [vmem:[%s1043_s1 + $0x28] sm:$0xff]  ;;  %v655_v22 = vld [vmem:[%s1043_s1 + $0x30] sm:$0xff] }
   0x6   :  { %v656_v23 = vld [vmem:[%s1043_s1 + $0x38] sm:$0xff]  ;;  %v17_v24 = vld [vmem:[%s1044_s0] sm:$0xff]  ;;  %v18_v28 = vld [vmem:[%s1044_s0 + $0x8] sm:$0xff] }
   0x7   :  { %v19_v32 = vld [vmem:[%s1044_s0 + $0x10] sm:$0xff]  ;;  %v20_v36 = vld [vmem:[%s1044_s0 + $0x18] sm:$0xff]  ;;  %v21_v40 = vld [vmem:[%s1044_s0 + $0x20] sm:$0xff] }
   0x8   :  { %v27_v43 = vld [vmem:[%s1044_s0 + $0x50] sm:$0xff]  ;;  %v22_v45 = vld [vmem:[%s1044_s0 + $0x28] sm:$0xff]  ;;  %v28_v49 = vld [vmem:[%s1044_s0 + $0x58] sm:$0xff] }
   0x9   :  { %v23_v50 = vld [vmem:[%s1044_s0 + $0x30] sm:$0xff]  ;;  %v672_v54 = vld [vmem:[%s1045_s3 + $0x38] sm:$0xff]  ;;  %v29_v56 = vld [vmem:[%s1044_s0 + $0x60] sm:$0xff] }
   0xa   :  { %427 = vmatpush.bf16.msra.mxu1 %v672_v54  ;;  %v671_v55 = vld [vmem:[%s1045_s3 + $0x30] sm:$0xff]  ;;  %681 = vmatpush.bf16.msra.mxu3 %v672_v54  ;;  %v670_v59 = vld [vmem:[%s1045_s3 + $0x28] sm:$0xff]  ;;  %v24_v60 = vld [vmem:[%s1044_s0 + $0x38] sm:$0xff] }
   0xb   :  { %211 = vmatpush.bf16.xpose.msra.mxu0 %v205_v3  ;;  %674 = vmatpush.bf16.xpose.msra.mxu2 %v205_v3  ;;  %v30_v61 = vld [vmem:[%s1044_s0 + $0x68] sm:$0xff]  ;;  %v25_v1 = vld [vmem:[%s1044_s0 + $0x40] sm:$0xff]  ;;  %v31_v2 = vld [vmem:[%s1044_s0 + $0x70] sm:$0xff] }
   0xc   :  { %v26_v6 = vld [vmem:[%s1044_s0 + $0x48] sm:$0xff]  ;;  %v668_v12 = vld [vmem:[%s1045_s3 + $0x18] sm:$0xff] }
   0xd   :  { %v666_v14 = vld [vmem:[%s1045_s3 + $0x8] sm:$0xff] }
   0xe   :  { %428 = vmatpush.bf16.msra.mxu1 %v671_v55  ;;  %682 = vmatpush.bf16.msra.mxu3 %v671_v55 }
  0x12   :  { %429 = vmatpush.bf16.msra.mxu1 %v670_v59  ;;  %683 = vmatpush.bf16.msra.mxu3 %v670_v59 }
  0x13   :  { %212 = vmatpush.bf16.xpose.msra.mxu0 %v202_v5  ;;  %675 = vmatpush.bf16.xpose.msra.mxu2 %v202_v5 }
  0x1b   :  { %213 = vmatpush.bf16.xpose.msra.mxu0 %v199_v7  ;;  %676 = vmatpush.bf16.xpose.msra.mxu2 %v199_v7  ;;  %v32_v7 = vld [vmem:[%s1044_s0 + $0x78] sm:$0xff] }
  0x23   :  { %214 = vmatpush.bf16.xpose.msra.mxu0 %v196_v9  ;;  %677 = vmatpush.bf16.xpose.msra.mxu2 %v196_v9 }
  0x2b   :  { %215 = vmatpush.bf16.xpose.msra.mxu0 %v193_v11  ;;  %678 = vmatpush.bf16.xpose.msra.mxu2 %v193_v11  ;;  %v669_v11 = vld [vmem:[%s1045_s3 + $0x20] sm:$0xff] }
  0x2c   :  { %430 = vmatpush.bf16.msra.mxu1 %v669_v11  ;;  %684 = vmatpush.bf16.msra.mxu3 %v669_v11 }
  0x30   :  { %431 = vmatpush.bf16.msra.mxu1 %v668_v12  ;;  %685 = vmatpush.bf16.msra.mxu3 %v668_v12 }
  0x33   :  { %216 = vmatpush.bf16.xpose.msra.mxu0 %v190_v13  ;;  %679 = vmatpush.bf16.xpose.msra.mxu2 %v190_v13  ;;  %v667_v13 = vld [vmem:[%s1045_s3 + $0x10] sm:$0xff] }
  0x34   :  { %432 = vmatpush.bf16.msra.mxu1 %v667_v13  ;;  %686 = vmatpush.bf16.msra.mxu3 %v667_v13 }
  0x38   :  { %433 = vmatpush.bf16.msra.mxu1 %v666_v14  ;;  %687 = vmatpush.bf16.msra.mxu3 %v666_v14 }
  0x3b   :  { %217 = vmatpush.bf16.xpose.msra.mxu0 %v187_v15  ;;  %680 = vmatpush.bf16.xpose.msra.mxu2 %v187_v15  ;;  %v665_v15 = vld [vmem:[%s1045_s3] sm:$0xff] }
  0x3c   :  { %434 = vmatpush.bf16.msra.mxu1 %v665_v15  ;;  %688 = vmatpush.bf16.msra.mxu3 %v665_v15 }
  0x42   :  { %609 = vmatmul.msk.bf16.vlgmr.msra.gmra.mxu0 %vm161_vm0, %v649_v16  ;;  %612 = vmatmul.msk.bf16.vlgmr.msra.gmra.mxu2 %vm161_vm0, %v652_v17 }
  0x52   :  { %610 = vmatmul.msk.bf16.gmra.mxu0 %vm161_vm0, %v650_v18  ;;  %613 = vmatmul.msk.bf16.gmra.mxu2 %vm161_vm0, %v653_v19 }
  0x62   :  { %611 = vmatmul.msk.bf16.gmra.mxu0 %vm161_vm0, %v651_v20  ;;  %614 = vmatmul.msk.bf16.gmra.mxu2 %vm161_vm0, %v654_v21 }
  0x72   :  { %615 = vmatmul.msk.bf16.gmra.mxu2 %vm161_vm0, %v655_v22 }
  0x82   :  { %616 = vmatmul.msk.bf16.gmra.mxu2 %vm161_vm0, %v656_v23 }
  0xbf   :  { %v219_v25 = vpop.f32.mrf.mxu0 }
  0xc0   :  { %v845_v26 = vadd.f32 %v219_v25, %v17_v24 }
  0xc2   :  { %259 = vmax.xlane.f32.xlu0 %v845_v26 }
  0xc5   :  { %v234_v27 = vpop.f32.mrf.mxu2 }
  0xc6   :  { %v892_v53 = vadd.f32 %v234_v27, %v23_v50 }
  0xc7   :  { %v221_v29 = vpop.f32.mrf.mxu0 }
  0xc8   :  { %v851_v30 = vadd.f32 %v221_v29, %v18_v28 }
  0xca   :  { %261 = vmax.xlane.f32.xlu0 %v851_v30 }
  0xcd   :  { %v236_v31 = vpop.f32.mrf.mxu2 }
  0xce   :  { %v917_v63 = vadd.f32 %v236_v31, %v24_v60 }
  0xcf   :  { %v224_v33 = vpop.f32.mrf.mxu0 }
  0xd0   :  { %v857_v34 = vadd.f32 %v224_v33, %v19_v32 }
  0xd2   :  { %263 = vmax.xlane.f32.xlu1 %v857_v34 }
  0xd5   :  { %v239_v35 = vpop.f32.mrf.mxu2 }
  0xd6   :  { %v929_v4 = vadd.f32 %v239_v35, %v25_v1 }
  0xd7   :  { %v226_v37 = vpop.f32.mrf.mxu0 }
  0xd8   :  { %v863_v38 = vadd.f32 %v226_v37, %v20_v36 }
  0xda   :  { %265 = vmax.xlane.f32.xlu1 %v863_v38 }
  0xdd   :  { %v241_v39 = vpop.f32.mrf.mxu2 }
  0xde   :  { %v941_v9 = vadd.f32 %v241_v39, %v26_v6 }
  0xdf   :  { %v229_v41 = vpop.f32.mrf.mxu0 }
  0xe0   :  { %v869_v42 = vadd.f32 %v229_v41, %v21_v40 }
  0xe2   :  { %267 = vmax.xlane.f32.xlu0 %v869_v42 }
  0xe5   :  { %v244_v44 = vpop.f32.mrf.mxu2 }
  0xe6   :  { %v878_v46 = vadd.f32 %v244_v44, %v27_v43 }
  0xe7   :  { %v231_v47 = vpop.f32.mrf.mxu0 }
  0xe8   :  { %v880_v48 = vadd.f32 %v231_v47, %v22_v45  ;;  %279 = vmax.xlane.f32.xlu2 %v878_v46 }
  0xea   :  { %269 = vmax.xlane.f32.xlu1 %v880_v48 }
  0xed   :  { %v246_v51 = vpop.f32.mrf.mxu2 }
  0xee   :  { %v890_v52 = vadd.f32 %v246_v51, %v28_v49 }
  0xf0   :  { %281 = vmax.xlane.f32.xlu2 %v890_v52 }
  0xf2   :  { %271 = vmax.xlane.f32.xlu1 %v892_v53 }
  0xf5   :  { %v249_v57 = vpop.f32.mrf.mxu2 }
  0xf6   :  { %v905_v58 = vadd.f32 %v249_v57, %v29_v56 }
  0xf8   :  { %283 = vmax.xlane.f32.xlu2 %v905_v58 }
  0xfd   :  { %v251_v62 = vpop.f32.mrf.mxu2 }
  0xfe   :  { %v919_v0 = vadd.f32 %v251_v62, %v30_v61 }
 0x100   :  { %273 = vmax.xlane.f32.xlu2 %v917_v63  ;;  %285 = vmax.xlane.f32.xlu0 %v919_v0 }
 0x105   :  { %v254_v3 = vpop.f32.mrf.mxu2 }
 0x106   :  { %v931_v5 = vadd.f32 %v254_v3, %v31_v2 }
 0x108   :  { %275 = vmax.xlane.f32.xlu2 %v929_v4  ;;  %287 = vmax.xlane.f32.xlu0 %v931_v5 }
 0x10d   :  { %v256_v8 = vpop.f32.mrf.mxu2 }
 0x10e   :  { %v943_v10 = vadd.f32 %v256_v8, %v32_v7 }
 0x110   :  { %289 = vmax.xlane.f32.xlu1 %v943_v10  ;;  %277 = vmax.xlane.f32.xlu0 %v941_v9 }
 0x135   :  { %v260_v16 = vpop.xlane.xlu0 %259 }
 0x136   :  { %v291_v17 = vsub.f32 %v845_v26, %v260_v16 }
 0x138   :  { %v307_v18 = vmul.f32 1.442695, %v291_v17 }
 0x13a   :  { %689 = vpow2.f32 %v307_v18 }
 0x13d   :  { %v262_v19 = vpop.xlane.xlu0 %261 }
 0x13e   :  { %v292_v20 = vsub.f32 %v851_v30, %v262_v19 }
 0x140   :  { %v690_v21 = vpop.eup %689  ;;  %v309_v22 = vmul.f32 1.442695, %v292_v20 }
 0x141   :  { %339 = vadd.xlane.f32.xlu1 %v690_v21 }
 0x142   :  { %691 = vpow2.f32 %v309_v22 }
 0x145   :  { %v264_v23 = vpop.xlane.xlu1 %263 }
 0x146   :  { %v293_v24 = vsub.f32 %v857_v34, %v264_v23 }
 0x148   :  { %v692_v25 = vpop.eup %691  ;;  %v311_v27 = vmul.f32 1.442695, %v293_v24 }
 0x149   :  { %341 = vadd.xlane.f32.xlu2 %v692_v25  ;;  %v371_v28 = vpack.c.bf16 %v692_v25, %v690_v21 }
 0x14a   :  { %693 = vpow2.f32 %v311_v27 }
 0x14b   :  { %435 = vmatmul.bf16.vlgmr.msra.gmra.mxu1 %v371_v28 }
 0x14d   :  { %v266_v29 = vpop.xlane.xlu1 %265 }
 0x14e   :  { %v294_v26 = vsub.f32 %v863_v38, %v266_v29 }
 0x150   :  { %v694_v31 = vpop.eup %693  ;;  %v313_v32 = vmul.f32 1.442695, %v294_v26 }
 0x151   :  { %343 = vadd.xlane.f32.xlu0 %v694_v31 }
 0x152   :  { %695 = vpow2.f32 %v313_v32 }
 0x155   :  { %v268_v30 = vpop.xlane.xlu0 %267 }
 0x156   :  { %v295_v35 = vsub.f32 %v869_v42, %v268_v30 }
 0x158   :  { %v696_v33 = vpop.eup %695  ;;  %v315_v34 = vmul.f32 1.442695, %v295_v35 }
 0x159   :  { %v372_v36 = vpack.c.bf16 %v696_v33, %v694_v31 }
 0x15a   :  { %697 = vpow2.f32 %v315_v34 }
 0x15b   :  { %v280_v37 = vpop.xlane.xlu2 %279  ;;  %440 = vmatmul.bf16.gmra.mxu1 %v372_v36 }
 0x15c   :  { %v301_v41 = vsub.f32 %v878_v46, %v280_v37 }
 0x15d   :  { %v270_v39 = vpop.xlane.xlu1 %269 }
 0x15e   :  { %v296_v40 = vsub.f32 %v880_v48, %v270_v39  ;;  %v327_v38 = vmul.f32 1.442695, %v301_v41 }
 0x160   :  { %v317_v43 = vmul.f32 1.442695, %v296_v40  ;;  %v698_v50 = vpop.eup %697 }
 0x162   :  { %699 = vpow2.f32 %v317_v43 }
 0x163   :  { %v282_v44 = vpop.xlane.xlu2 %281  ;;  %701 = vpow2.f32 %v327_v38 }
 0x164   :  { %v302_v45 = vsub.f32 %v890_v52, %v282_v44 }
 0x165   :  { %v272_v47 = vpop.xlane.xlu1 %271 }
 0x166   :  { %v329_v49 = vmul.f32 1.442695, %v302_v45  ;;  %v297_v42 = vsub.f32 %v892_v53, %v272_v47 }
 0x168   :  { %v700_v51 = vpop.eup %699  ;;  %703 = vpow2.f32 %v329_v49  ;;  %v319_v54 = vmul.f32 1.442695, %v297_v42 }
 0x169   :  { %v373_v55 = vpack.c.bf16 %v700_v51, %v698_v50  ;;  %v702_v46 = vpop.eup %701 }
 0x16a   :  { %705 = vpow2.f32 %v319_v54 }
 0x16b   :  { %v284_v48 = vpop.xlane.xlu2 %283  ;;  %445 = vmatmul.bf16.gmra.mxu1 %v373_v55 }
 0x16c   :  { %v303_v57 = vsub.f32 %v905_v58, %v284_v48 }
 0x16e   :  { %v704_v56 = vpop.eup %703  ;;  %v331_v52 = vmul.f32 1.442695, %v303_v57 }
 0x16f   :  { %v376_v59 = vpack.c.bf16 %v704_v56, %v702_v46 }
 0x170   :  { %v706_v60 = vpop.eup %705  ;;  %707 = vpow2.f32 %v331_v52 }
 0x171   :  { %460 = vmatmul.bf16.vlgmr.msra.gmra.mxu3 %v376_v59  ;;  %351 = vadd.xlane.f32.xlu1 %v706_v60 }
 0x173   :  { %v274_v61 = vpop.xlane.xlu2 %273  ;;  %v286_v53 = vpop.xlane.xlu0 %285 }
 0x174   :  { %v298_v62 = vsub.f32 %v917_v63, %v274_v61  ;;  %v304_v1 = vsub.f32 %v919_v0, %v286_v53 }
 0x176   :  { %v321_v2 = vmul.f32 1.442695, %v298_v62  ;;  %v333_v3 = vmul.f32 1.442695, %v304_v1  ;;  %v708_v8 = vpop.eup %707 }
 0x178   :  { %709 = vpow2.f32 %v321_v2 }
 0x179   :  { %711 = vpow2.f32 %v333_v3  ;;  %345 = vadd.xlane.f32.xlu1 %v696_v33 }
 0x17b   :  { %v276_v6 = vpop.xlane.xlu2 %275  ;;  %v288_v7 = vpop.xlane.xlu0 %287 }
 0x17c   :  { %v299_v58 = vsub.f32 %v929_v4, %v276_v6  ;;  %v305_v14 = vsub.f32 %v931_v5, %v288_v7 }
 0x17e   :  { %v710_v11 = vpop.eup %709  ;;  %v323_v12 = vmul.f32 1.442695, %v299_v58  ;;  %v335_v15 = vmul.f32 1.442695, %v305_v14 }
 0x17f   :  { %v712_v13 = vpop.eup %711  ;;  %353 = vadd.xlane.f32.xlu2 %v710_v11  ;;  %v374_v63 = vpack.c.bf16 %v710_v11, %v706_v60 }
 0x180   :  { %713 = vpow2.f32 %v323_v12  ;;  %v377_v0 = vpack.c.bf16 %v712_v13, %v708_v8 }
 0x181   :  { %450 = vmatmul.bf16.gmra.mxu1 %v374_v63  ;;  %715 = vpow2.f32 %v335_v15 }
 0x182   :  { %465 = vmatmul.bf16.gmra.mxu3 %v377_v0 }
 0x183   :  { %v290_v16 = vpop.xlane.xlu1 %289  ;;  %v278_v17 = vpop.xlane.xlu0 %277 }
 0x184   :  { %v306_v18 = vsub.f32 %v943_v10, %v290_v16  ;;  %v300_v19 = vsub.f32 %v941_v9, %v278_v17 }
 0x186   :  { %v714_v4 = vpop.eup %713  ;;  %v337_v20 = vmul.f32 1.442695, %v306_v18  ;;  %v325_v21 = vmul.f32 1.442695, %v300_v19 }
 0x187   :  { %355 = vadd.xlane.f32.xlu0 %v714_v4  ;;  %347 = vadd.xlane.f32.xlu2 %v698_v50  ;;  %v716_v5 = vpop.eup %715 }
 0x188   :  { %717 = vpow2.f32 %v337_v20 }
 0x189   :  { %719 = vpow2.f32 %v325_v21 }
 0x18e   :  { %v718_v22 = vpop.eup %717 }
 0x18f   :  { %v720_v23 = vpop.eup %719  ;;  %349 = vadd.xlane.f32.xlu0 %v700_v51  ;;  %359 = vadd.xlane.f32.xlu2 %v702_v46  ;;  %v378_v24 = vpack.c.bf16 %v718_v22, %v716_v5 }
 0x190   :  { %357 = vadd.xlane.f32.xlu1 %v720_v23  ;;  %v375_v25 = vpack.c.bf16 %v720_v23, %v714_v4 }
 0x192   :  { %455 = vmatmul.bf16.gmra.mxu1 %v375_v25  ;;  %470 = vmatmul.bf16.gmra.mxu3 %v378_v24 }
 0x197   :  { %361 = vadd.xlane.f32.xlu0 %v704_v56  ;;  %365 = vadd.xlane.f32.xlu2 %v712_v13 }
 0x198   :  { %363 = vadd.xlane.f32.xlu1 %v708_v8 }
 0x19f   :  { %367 = vadd.xlane.f32.xlu0 %v716_v5 }
 0x1a0   :  { %369 = vadd.xlane.f32.xlu1 %v718_v22 }
 0x1b4   :  { %v340_v9 = vpop.xlane.xlu1 %339 }
 0x1b5   :  { %721 = vrcp.f32 %v340_v9 }
 0x1bb   :  { %v722_v27 = vpop.eup %721 }
 0x1bc   :  { %v342_v10 = vpop.xlane.xlu2 %341 }
 0x1bd   :  { %723 = vrcp.f32 %v342_v10 }
 0x1c3   :  { %v724_v32 = vpop.eup %723 }
 0x1c4   :  { %v344_v31 = vpop.xlane.xlu0 %343 }
 0x1c5   :  { %725 = vrcp.f32 %v344_v31 }
 0x1c8   :  { %v436_v28 = vpop.f32.mrf.mxu1 }
 0x1c9   :  { %v492_v29 = vmul.f32 %v722_v27, %v436_v28 }
 0x1cb   :  { %v508_v26 = vpack.c.bf16 %v492_v29, %v492_v29  ;;  %v726_v36 = vpop.eup %725 }
 0x1cd   :  { %525 = vst.msk [vmem:[%s1046_s4] sm:$0xf] %vm524_vm1, %v508_v26 }
 0x1d0   :  { %v438_v30 = vpop.f32.mrf.mxu1 }
 0x1d1   :  { %v493_v33 = vmul.f32 %v724_v32, %v438_v30 }
 0x1d3   :  { %v509_v35 = vpack.c.bf16 %v493_v33, %v493_v33 }
 0x1d5   :  { %526 = vst.msk [vmem:[%s1046_s4 + $0x4] sm:$0xf] %vm524_vm1, %v509_v35 }
 0x1d8   :  { %v441_v37 = vpop.f32.mrf.mxu1 }
 0x1d9   :  { %v494_v34 = vmul.f32 %v726_v36, %v441_v37 }
 0x1db   :  { %v510_v39 = vpack.c.bf16 %v494_v34, %v494_v34 }
 0x1dd   :  { %527 = vst.msk [vmem:[%s1046_s4 + $0x8] sm:$0xf] %vm524_vm1, %v510_v39 }
 0x1e0   :  { %v443_v40 = vpop.f32.mrf.mxu1 }
 0x1e4   :  { %v352_v41 = vpop.xlane.xlu1 %351 }
 0x1e8   :  { %v446_v43 = vpop.f32.mrf.mxu1 }
 0x1ec   :  { %v346_v38 = vpop.xlane.xlu1 %345 }
 0x1ed   :  { %727 = vrcp.f32 %v346_v38 }
 0x1ee   :  { %729 = vrcp.f32 %v352_v41 }
 0x1f0   :  { %v448_v50 = vpop.f32.mrf.mxu1 }
 0x1f2   :  { %v354_v44 = vpop.xlane.xlu2 %353 }
 0x1f3   :  { %v728_v45 = vpop.eup %727 }
 0x1f4   :  { %v495_v47 = vmul.f32 %v728_v45, %v443_v40  ;;  %v461_v49 = vpop.f32.mrf.mxu3  ;;  %v730_v48 = vpop.eup %729 }
 0x1f6   :  { %v511_v42 = vpack.c.bf16 %v495_v47, %v495_v47 }
 0x1f8   :  { %528 = vst.msk [vmem:[%s1046_s4 + $0xc] sm:$0xf] %vm524_vm1, %v511_v42 }
 0x1fa   :  { %v348_v51 = vpop.xlane.xlu2 %347  ;;  %v356_v54 = vpop.xlane.xlu0 %355 }
 0x1fb   :  { %731 = vrcp.f32 %v348_v51 }
 0x1fc   :  { %v463_v55 = vpop.f32.mrf.mxu3  ;;  %733 = vrcp.f32 %v354_v44 }
 0x1fe   :  { %v451_v46 = vpop.f32.mrf.mxu1 }
 0x1ff   :  { %v498_v56 = vmul.f32 %v730_v48, %v451_v46 }
 0x201   :  { %v732_v57 = vpop.eup %731  ;;  %v514_v59 = vpack.c.bf16 %v498_v56, %v498_v56 }
 0x202   :  { %v496_v60 = vmul.f32 %v732_v57, %v446_v43  ;;  %v360_v52 = vpop.xlane.xlu2 %359  ;;  %v350_v61 = vpop.xlane.xlu0 %349 }
 0x203   :  { %531 = vst.msk [vmem:[%s1046_s4 + $0x18] sm:$0xf] %vm524_vm1, %v514_v59  ;;  %735 = vrcp.f32 %v360_v52  ;;  %v358_v53 = vpop.xlane.xlu1 %357  ;;  %v734_v2 = vpop.eup %733 }
 0x204   :  { %v512_v62 = vpack.c.bf16 %v496_v60, %v496_v60  ;;  %737 = vrcp.f32 %v350_v61 }
 0x205   :  { %v466_v1 = vpop.f32.mrf.mxu3  ;;  %739 = vrcp.f32 %v356_v54 }
 0x206   :  { %529 = vst.msk [vmem:[%s1046_s4 + $0x10] sm:$0xf] %vm524_vm1, %v512_v62  ;;  %v453_v3 = vpop.f32.mrf.mxu1 }
 0x207   :  { %v499_v6 = vmul.f32 %v734_v2, %v453_v3 }
 0x209   :  { %v736_v7 = vpop.eup %735  ;;  %v515_v58 = vpack.c.bf16 %v499_v6, %v499_v6 }
 0x20a   :  { %v502_v8 = vmul.f32 %v736_v7, %v461_v49  ;;  %v366_v11 = vpop.xlane.xlu2 %365  ;;  %v362_v12 = vpop.xlane.xlu0 %361 }
 0x20b   :  { %v738_v13 = vpop.eup %737  ;;  %532 = vst.msk [vmem:[%s1046_s4 + $0x1c] sm:$0xf] %vm524_vm1, %v515_v58  ;;  %741 = vrcp.f32 %v366_v11  ;;  %v364_v14 = vpop.xlane.xlu1 %363 }
 0x20c   :  { %v518_v63 = vpack.c.bf16 %v502_v8, %v502_v8  ;;  %v497_v0 = vmul.f32 %v738_v13, %v448_v50  ;;  %743 = vrcp.f32 %v364_v14  ;;  %v740_v17 = vpop.eup %739 }
 0x20d   :  { %745 = vrcp.f32 %v362_v12  ;;  %v468_v15 = vpop.f32.mrf.mxu3 }
 0x20e   :  { %535 = vst.msk [vmem:[%s1046_s4 + $0x28] sm:$0xf] %vm524_vm1, %v518_v63  ;;  %v513_v16 = vpack.c.bf16 %v497_v0, %v497_v0  ;;  %747 = vrcp.f32 %v358_v53 }
 0x20f   :  { %v456_v18 = vpop.f32.mrf.mxu1 }
 0x210   :  { %530 = vst.msk [vmem:[%s1046_s4 + $0x14] sm:$0xf] %vm524_vm1, %v513_v16  ;;  %v500_v19 = vmul.f32 %v740_v17, %v456_v18 }
 0x211   :  { %v742_v4 = vpop.eup %741 }
 0x212   :  { %v744_v20 = vpop.eup %743  ;;  %v505_v21 = vmul.f32 %v742_v4, %v468_v15  ;;  %v516_v5 = vpack.c.bf16 %v500_v19, %v500_v19  ;;  %v368_v22 = vpop.xlane.xlu0 %367 }
 0x213   :  { %v746_v23 = vpop.eup %745  ;;  %v504_v24 = vmul.f32 %v744_v20, %v466_v1  ;;  %749 = vrcp.f32 %v368_v22  ;;  %v370_v10 = vpop.xlane.xlu1 %369 }
 0x214   :  { %v503_v25 = vmul.f32 %v746_v23, %v463_v55  ;;  %v521_v9 = vpack.c.bf16 %v505_v21, %v505_v21  ;;  %533 = vst.msk [vmem:[%s1046_s4 + $0x20] sm:$0xf] %vm524_vm1, %v516_v5  ;;  %v748_v26 = vpop.eup %747  ;;  %751 = vrcp.f32 %v370_v10 }
 0x215   :  { %v520_v27 = vpack.c.bf16 %v504_v24, %v504_v24  ;;  %v471_v28 = vpop.f32.mrf.mxu3 }
 0x216   :  { %v519_v29 = vpack.c.bf16 %v503_v25, %v503_v25  ;;  %538 = vst.msk [vmem:[%s1046_s4 + $0x34] sm:$0xf] %vm524_vm1, %v521_v9 }
 0x217   :  { %537 = vst.msk [vmem:[%s1046_s4 + $0x30] sm:$0xf] %vm524_vm1, %v520_v27  ;;  %v458_v31 = vpop.f32.mrf.mxu1 }
 0x218   :  { %536 = vst.msk [vmem:[%s1046_s4 + $0x2c] sm:$0xf] %vm524_vm1, %v519_v29  ;;  %v501_v32 = vmul.f32 %v748_v26, %v458_v31 }
 0x219   :  { %v750_v30 = vpop.eup %749 }
 0x21a   :  { %v506_v33 = vmul.f32 %v750_v30, %v471_v28  ;;  %v517_v35 = vpack.c.bf16 %v501_v32, %v501_v32  ;;  %v752_v37 = vpop.eup %751 }
 0x21c   :  { %v522_v36 = vpack.c.bf16 %v506_v33, %v506_v33  ;;  %534 = vst.msk [vmem:[%s1046_s4 + $0x24] sm:$0xf] %vm524_vm1, %v517_v35 }
 0x21d   :  { %v473_v34 = vpop.f32.mrf.mxu3 }
 0x21e   :  { %539 = vst.msk [vmem:[%s1046_s4 + $0x38] sm:$0xf] %vm524_vm1, %v522_v36  ;;  %v507_v39 = vmul.f32 %v752_v37, %v473_v34 }
 0x220   :  { %v523_v40 = vpack.c.bf16 %v507_v39, %v507_v39 }
 0x222   :  { %540 = vst.msk [vmem:[%s1046_s4 + $0x3c] sm:$0xf] %vm524_vm1, %v523_v40 }

</bundles_post_ra>
